<compile_context>
chip_gen: v7x
topology: tpu7x:2x2x1
jax: 0.10.0
libtpu: 0.0.40
codegen_flags: <defaults>
</compile_context>

<pallas_src>
import functools
import numpy as np
import jax
import jax.numpy as jnp
from jax import lax
from jax.experimental import pallas as pl
from jax.experimental.pallas import tpu as pltpu

# ---------------- config (mirrors the PyTorch module) ----------------
cnv_dim = 256
in_channels = [256, 256, 384, 384, 384, 512]
out_channels = 80
modules_cfg = [2, 2, 2, 2, 2, 4]
n_levels = 5
nstack = 2
BN_EPS = 1e-5


def _round_up(x, m):
    return (x + m - 1) // m * m


def _pick_div(n, target):
    """Largest divisor of n that is <= min(n, target)."""
    t = min(n, target)
    while n % t:
        t -= 1
    return t


# ======================= Pallas kernels =======================

def _conv_kernel(x_ref, w_ref, b_ref, o_ref, *, k, s, th, wo, cin, tco, relu, flat):
    """Implicit-GEMM conv.

    x_ref: (1, s*s, Hph, Wph, Cin) bf16  -- full phase-split padded image (one batch elem)
    w_ref: (k*k, Cin, tco)         bf16  -- weight slice for this Cout tile
    b_ref: (1, tco)                f32
    o_ref: (1, th, Wo, tco)        f32
    grid : (N, Cout//tco, Ho//th)
    """
    ho0 = pl.program_id(2) * th
    bias = b_ref[...]

    if flat:  # Wo is a multiple of 8: flatten (th, Wo) rows into the GEMM M axis
        acc = jnp.zeros((th * wo, tco), jnp.float32)
        for dy in range(k):
            for dx in range(k):
                phase = (dy % s) * s + (dx % s)
                a = x_ref[0, phase, pl.ds(ho0 + dy // s, th), pl.ds(dx // s, wo), :]
                acc += jnp.dot(a.reshape(th * wo, cin), w_ref[dy * k + dx],
                               preferred_element_type=jnp.float32)
        out = acc + bias
        if relu:
            out = jnp.maximum(out, 0.0)
        o_ref[...] = out.reshape(1, th, wo, tco)
    else:     # tiny spatial tiles (deep hourglass levels): one small GEMM per row
        for r in range(th):
            acc = jnp.zeros((wo, tco), jnp.float32)
            for dy in range(k):
                for dx in range(k):
                    phase = (dy % s) * s + (dx % s)
                    a = x_ref[0, phase, pl.ds(ho0 + dy // s + r, 1),
                              pl.ds(dx // s, wo), :]
                    acc += jnp.dot(a.reshape(wo, cin), w_ref[dy * k + dx],
                                   preferred_element_type=jnp.float32)
            out = acc + bias
            if relu:
                out = jnp.maximum(out, 0.0)
            o_ref[0, r] = out


@functools.partial(jax.jit, static_argnames=("stride", "relu"))
def conv2d(x, w, bias, stride=1, relu=False):
    """NHWC conv with SAME-style padding (k-1)//2, out = relu?(conv(x, w) + bias)."""
    N, H, W, Cin = x.shape
    k = w.shape[0]
    Cout = w.shape[3]
    s = stride
    pad = (k - 1) // 2
    Ho = (H + 2 * pad - k) // s + 1
    Wo = (W + 2 * pad - k) // s + 1
    x = x.astype(jnp.bfloat16)
    w = w.astype(jnp.bfloat16)

    if k > 1 and Cin <= 8:
        # tiny-Cin stem (7x7 on 3 channels): fold taps into channels in XLA
        # (negligible inflation at 3 channels) and run it as a 1x1 conv.
        xp = jnp.pad(x, ((0, 0), (pad, pad), (pad, pad), (0, 0)))
        cols = [lax.slice(xp, (0, dy, dx, 0),
                          (N, dy + (Ho - 1) * s + 1, dx + (Wo - 1) * s + 1, Cin),
                          (1, s, s, 1))
                for dy in range(k) for dx in range(k)]
        x = jnp.concatenate(cols, axis=-1)
        w = w.reshape(1, 1, k * k * Cin, Cout)
        k, s, pad = 1, 1, 0
        N, H, W, Cin = x.shape

    # zero-pad spatially, pad H/W up to a multiple of the stride, then split into
    # s*s phase images so every tap is a contiguous (unstrided) window of one phase.
    Hp = _round_up(H + 2 * pad, s)
    Wp = _round_up(W + 2 * pad, s)
    Hph, Wph = Hp // s, Wp // s
    xp = jnp.pad(x, ((0, 0), (pad, Hp - H - pad), (pad, Wp - W - pad), (0, 0)))
    xph = xp.reshape(N, Hph, s, Wph, s, Cin).transpose(0, 2, 4, 1, 3, 5)
    xph = xph.reshape(N, s * s, Hph, Wph, Cin)

    wr = w.reshape(k * k, Cin, Cout)
    br = bias.reshape(1, Cout).astype(jnp.float32)

    if Cout % 256 == 0:
        tco = 256
    elif Cout % 128 == 0:
        tco = 128
    else:
        tco = Cout
    th = _pick_div(Ho, max(1, 512 // Wo))
    flat = (Wo % 8 == 0)
    grid = (N, Cout // tco, Ho // th)

    out = pl.pallas_call(
        functools.partial(_conv_kernel, k=k, s=s, th=th, wo=Wo, cin=Cin,
                          tco=tco, relu=relu, flat=flat),
        out_shape=jax.ShapeDtypeStruct((N, Ho, Wo, Cout), jnp.float32),
        grid=grid,
        in_specs=[
            pl.BlockSpec((1, s * s, Hph, Wph, Cin),
                         lambda n, c, h: (n, 0, 0, 0, 0)),
            pl.BlockSpec((k * k, Cin, tco), lambda n, c, h: (0, 0, c)),
            pl.BlockSpec((1, tco), lambda n, c, h: (0, c)),
        ],
        out_specs=pl.BlockSpec((1, th, Wo, tco), lambda n, c, h: (n, h, 0, c)),
        compiler_params=pltpu.CompilerParams(
            dimension_semantics=("parallel", "parallel", "arbitrary")),
    )(xph, wr, br)
    return out


# ---- BatchNorm statistics (training mode / batch stats, PyTorch default) ----

def _bn_stats_kernel(x_ref, mean_ref, rstd_ref, sum_ref, sq_ref, *, m_total):
    @pl.when(pl.program_id(0) == 0)
    def _():
        sum_ref[...] = jnp.zeros_like(sum_ref)
        sq_ref[...] = jnp.zeros_like(sq_ref)

    x = x_ref[...]
    sum_ref[...] += jnp.sum(x, axis=0, keepdims=True)
    sq_ref[...] += jnp.sum(x * x, axis=0, keepdims=True)

    @pl.when(pl.program_id(0) == pl.num_programs(0) - 1)
    def _():
        mean = sum_ref[...] * (1.0 / m_total)
        var = jnp.maximum(sq_ref[...] * (1.0 / m_total) - mean * mean, 0.0)
        mean_ref[...] = mean
        rstd_ref[...] = lax.rsqrt(var + BN_EPS)


def _bn_stats(x2d):
    M, C = x2d.shape
    tm = _pick_div(M, 1024)
    mean, rstd = pl.pallas_call(
        functools.partial(_bn_stats_kernel, m_total=float(M)),
        out_shape=(jax.ShapeDtypeStruct((1, C), jnp.float32),
                   jax.ShapeDtypeStruct((1, C), jnp.float32)),
        grid=(M // tm,),
        in_specs=[pl.BlockSpec((tm, C), lambda i: (i, 0))],
        out_specs=(pl.BlockSpec((1, C), lambda i: (0, 0)),
                   pl.BlockSpec((1, C), lambda i: (0, 0))),
        scratch_shapes=[pltpu.VMEM((1, C), jnp.float32),
                        pltpu.VMEM((1, C), jnp.float32)],
        compiler_params=pltpu.CompilerParams(dimension_semantics=("arbitrary",)),
    )(x2d)
    return mean, rstd


@jax.jit
def bn_scale_shift(x, gamma, beta):
    """Return per-channel (scale, shift) such that BN(x) == x*scale + shift."""
    N, H, W, C = x.shape
    mean, rstd = _bn_stats(x.reshape(N * H * W, C))
    scale = gamma * rstd[0]
    shift = beta - mean[0] * scale
    return scale, shift


# ---- tiled elementwise: affine(+ReLU) and dual-affine add(+ReLU) ----

def _affine_kernel(x_ref, s_ref, t_ref, o_ref, *, relu):
    y = x_ref[...] * s_ref[...] + t_ref[...]
    if relu:
        y = jnp.maximum(y, 0.0)
    o_ref[...] = y


@functools.partial(jax.jit, static_argnames=("relu",))
def affine_act(x, scale, shift, relu=False):
    N, H, W, C = x.shape
    M = N * H * W
    tm = _pick_div(M, 1024)
    out = pl.pallas_call(
        functools.partial(_affine_kernel, relu=relu),
        out_shape=jax.ShapeDtypeStruct((M, C), jnp.float32),
        grid=(M // tm,),
        in_specs=[pl.BlockSpec((tm, C), lambda i: (i, 0)),
                  pl.BlockSpec((1, C), lambda i: (0, 0)),
                  pl.BlockSpec((1, C), lambda i: (0, 0))],
        out_specs=pl.BlockSpec((tm, C), lambda i: (i, 0)),
        compiler_params=pltpu.CompilerParams(dimension_semantics=("parallel",)),
    )(x.reshape(M, C), scale.reshape(1, C), shift.reshape(1, C))
    return out.reshape(N, H, W, C)


def _affine2_add_kernel(a_ref, sa_ref, ta_ref, b_ref, sb_ref, tb_ref, o_ref, *, relu):
    y = (a_ref[...] * sa_ref[...] + ta_ref[...]
         + b_ref[...] * sb_ref[...] + tb_ref[...])
    if relu:
        y = jnp.maximum(y, 0.0)
    o_ref[...] = y


@functools.partial(jax.jit, static_argnames=("relu",))
def affine2_add(a, sa, ta, b, sb, tb, relu=False):
    """relu?((a*sa + ta) + (b*sb + tb)) -- fuses the BN apply into the merge add."""
    N, H, W, C = a.shape
    M = N * H * W
    tm = _pick_div(M, 1024)
    out = pl.pallas_call(
        functools.partial(_affine2_add_kernel, relu=relu),
        out_shape=jax.ShapeDtypeStruct((M, C), jnp.float32),
        grid=(M // tm,),
        in_specs=[pl.BlockSpec((tm, C), lambda i: (i, 0)),
                  pl.BlockSpec((1, C), lambda i: (0, 0)),
                  pl.BlockSpec((1, C), lambda i: (0, 0)),
                  pl.BlockSpec((tm, C), lambda i: (i, 0)),
                  pl.BlockSpec((1, C), lambda i: (0, 0)),
                  pl.BlockSpec((1, C), lambda i: (0, 0))],
        out_specs=pl.BlockSpec((tm, C), lambda i: (i, 0)),
        compiler_params=pltpu.CompilerParams(dimension_semantics=("parallel",)),
    )(a.reshape(M, C), sa.reshape(1, C), ta.reshape(1, C),
      b.reshape(M, C), sb.reshape(1, C), tb.reshape(1, C))
    return out.reshape(N, H, W, C)


# ---- fused nearest-neighbour upsample(x2) + add (hourglass merge) ----

def _upsample_add_kernel(a_ref, l_ref, o_ref):
    l = l_ref[...]                            # (1, th//2, W, C)
    th2 = l.shape[1]
    lh = jnp.broadcast_to(l[:, :, None, :, :],
                          (1, th2, 2, l.shape[2], l.shape[3]))
    o_ref[...] = a_ref[...] + lh.reshape(a_ref.shape)


@jax.jit
def upsample_add(a, low):
    """a + nearest_upsample2(low); a:(N,H,W,C), low:(N,H//2,W//2,C)."""
    N, H, W, C = a.shape
    lw = jnp.repeat(low, 2, axis=2)           # cheap W-repeat of the small tensor
    th = _pick_div(H, 16)                     # H-repeat handled in-kernel
    out = pl.pallas_call(
        _upsample_add_kernel,
        out_shape=jax.ShapeDtypeStruct((N, H, W, C), jnp.float32),
        grid=(N, H // th),
        in_specs=[pl.BlockSpec((1, th, W, C), lambda n, h: (n, h, 0, 0)),
                  pl.BlockSpec((1, th // 2, W, C), lambda n, h: (n, h, 0, 0))],
        out_specs=pl.BlockSpec((1, th, W, C), lambda n, h: (n, h, 0, 0)),
        compiler_params=pltpu.CompilerParams(
            dimension_semantics=("parallel", "parallel")),
    )(a, lw)
    return out


# ---- corner pooling: directional cumulative max with a VMEM carry over the grid ----

def _pool_scan_kernel(x_ref, o_ref, carry_ref, *, sb, axis, reverse):
    @pl.when(pl.program_id(1) == 0)
    def _():
        carry_ref[...] = jnp.full(carry_ref.shape, -jnp.inf, jnp.float32)

    c = carry_ref[...]
    order = range(sb - 1, -1, -1) if reverse else range(sb)
    for r in order:
        if axis == 1:
            c = jnp.maximum(c, x_ref[:, r, :, :])
            o_ref[:, r, :, :] = c
        else:
            c = jnp.maximum(c, x_ref[:, :, r, :])
            o_ref[:, :, r, :] = c
    carry_ref[...] = c


@functools.partial(jax.jit, static_argnames=("axis", "reverse"))
def corner_pool(x, axis, reverse):
    """CornerNet corner pooling (directional cumulative max) on NHWC."""
    N, H, W, C = x.shape
    S = H if axis == 1 else W
    sb = _pick_div(S, 8)
    nS = S // sb
    if axis == 1:
        blk = (1, sb, W, C)
        idx = (lambda n, s: (n, (nS - 1 - s) if reverse else s, 0, 0))
        carry_shape = (1, W, C)
    else:
        blk = (1, H, sb, C)
        idx = (lambda n, s: (n, 0, (nS - 1 - s) if reverse else s, 0))
        carry_shape = (1, H, C)
    out = pl.pallas_call(
        functools.partial(_pool_scan_kernel, sb=sb, axis=axis, reverse=reverse),
        out_shape=jax.ShapeDtypeStruct((N, H, W, C), jnp.float32),
        grid=(N, nS),
        in_specs=[pl.BlockSpec(blk, idx)],
        out_specs=pl.BlockSpec(blk, idx),
        scratch_shapes=[pltpu.VMEM(carry_shape, jnp.float32)],
        compiler_params=pltpu.CompilerParams(
            dimension_semantics=("arbitrary", "arbitrary")),
    )(x)
    return out


# TODO(synk): the `pool` class and the corner-pooling ops are referenced but not
# defined in the provided snippet; canonical CornerNet definitions are used here.
def top_pooling(x):    return corner_pool(x, axis=1, reverse=True)
def left_pooling(x):   return corner_pool(x, axis=2, reverse=True)
def bottom_pooling(x): return corner_pool(x, axis=1, reverse=False)
def right_pooling(x):  return corner_pool(x, axis=2, reverse=False)


# ======================= parameters (deterministic synthetic init) =======================

class ParamGen:
    def __init__(self, seed):
        self._key = jax.random.PRNGKey(seed)
        self._n = 0

    def conv_w(self, k, cin, cout):
        self._n += 1
        key = jax.random.fold_in(self._key, self._n)
        scale = 1.0 / np.sqrt(k * k * cin)
        return (scale * jax.random.normal(key, (k, k, cin, cout))).astype(jnp.bfloat16)


def init_conv2d(pg, k, cin, cout):
    return {"w": pg.conv_w(k, cin, cout), "b": jnp.zeros((cout,), jnp.float32)}


def init_bn(c):
    return {"gamma": jnp.ones((c,), jnp.float32),
            "beta": jnp.zeros((c,), jnp.float32)}


# --- `convolution` module: conv -> BN -> ReLU (or conv(+bias) -> ReLU) ---
def init_convolution(pg, k, cin, cout, with_bn=True):
    return {"with_bn": with_bn,
            "conv": init_conv2d(pg, k, cin, cout),
            "bn": init_bn(cout) if with_bn else None}


def apply_convolution(p, x, stride=1):
    w = p["conv"]["w"]
    if p["with_bn"]:
        y = conv2d(x, w, p["conv"]["b"], stride=stride, relu=False)
        s, t = bn_scale_shift(y, p["bn"]["gamma"], p["bn"]["beta"])
        return affine_act(y, s, t, relu=True)
    return conv2d(x, w, p["conv"]["b"], stride=stride, relu=True)


# --- `residual` module ---
def init_residual(pg, k, cin, cout, stride=1):
    p = {"stride": stride,
         "conv1": init_conv2d(pg, 3, cin, cout),
         "bn1": init_bn(cout),
         "conv2": init_conv2d(pg, 3, cout, cout),
         "bn2": init_bn(cout),
         "skip": None}
    if stride != 1 or cin != cout:
        p["skip"] = {"conv": init_conv2d(pg, 1, cin, cout), "bn": init_bn(cout)}
    return p


def apply_residual(p, x):
    cout = p["conv1"]["w"].shape[3]
    y1 = conv2d(x, p["conv1"]["w"], p["conv1"]["b"], stride=p["stride"])
    s1, t1 = bn_scale_shift(y1, p["bn1"]["gamma"], p["bn1"]["beta"])
    r1 = affine_act(y1, s1, t1, relu=True)
    y2 = conv2d(r1, p["conv2"]["w"], p["conv2"]["b"])
    s2, t2 = bn_scale_shift(y2, p["bn2"]["gamma"], p["bn2"]["beta"])
    if p["skip"] is not None:
        ys = conv2d(x, p["skip"]["conv"]["w"], p["skip"]["conv"]["b"], stride=p["stride"])
        ss, ts = bn_scale_shift(ys, p["skip"]["bn"]["gamma"], p["skip"]["bn"]["beta"])
    else:
        ys = x
        ss = jnp.ones((cout,), jnp.float32)
        ts = jnp.zeros((cout,), jnp.float32)
    # bn2-apply + skip-bn-apply + add + relu fused in one tiled kernel
    return affine2_add(y2, s2, t2, ys, ss, ts, relu=True)


def init_make_layer(pg, k, inp_dim, out_dim, mods):
    layers = [init_residual(pg, k, inp_dim, out_dim)]
    layers += [init_residual(pg, k, out_dim, out_dim) for _ in range(mods - 1)]
    return layers


def init_make_layer_revr(pg, k, inp_dim, out_dim, mods):
    layers = [init_residual(pg, k, inp_dim, inp_dim) for _ in range(mods - 1)]
    layers.append(init_residual(pg, k, inp_dim, out_dim))
    return layers


def init_hourglass_layer(pg, k, inp_dim, out_dim, iters):
    layers = [init_residual(pg, k, inp_dim, out_dim, stride=2)]
    layers += [init_residual(pg, k, out_dim, out_dim) for _ in range(iters - 1)]
    return layers


def apply_sequential(layers, x):
    for lp in layers:
        x = apply_residual(lp, x)
    return x


# --- `hourglass_backbone` ---
def init_hourglass(pg, k, dim, module):
    curr_mod, next_mod = module[0], module[1]
    curr_dim, next_dim = dim[0], dim[1]
    p = {"n": k,
         "up1": init_make_layer(pg, 3, curr_dim, curr_dim, curr_mod),
         "low1": init_hourglass_layer(pg, 3, curr_dim, next_dim, curr_mod)}
    if k > 1:
        p["low2"] = init_hourglass(pg, k - 1, dim[1:], module[1:])
    else:
        p["low2"] = init_make_layer(pg, 3, next_dim, next_dim, next_mod)
    p["low3"] = init_make_layer_revr(pg, 3, next_dim, curr_dim, curr_mod)
    return p


def apply_hourglass(p, x):
    up1 = apply_sequential(p["up1"], x)
    low1 = apply_sequential(p["low1"], x)
    if p["n"] > 1:
        low2 = apply_hourglass(p["low2"], low1)
    else:
        low2 = apply_sequential(p["low2"], low1)
    low3 = apply_sequential(p["low3"], low2)
    return upsample_add(up1, low3)            # fused nearest-upsample + add


# --- corner `pool` module (canonical CornerNet structure) ---
def init_pool(pg, dim):
    return {"p1_conv1": init_convolution(pg, 3, dim, 128),
            "p2_conv1": init_convolution(pg, 3, dim, 128),
            "p_conv1": init_conv2d(pg, 3, 128, dim),
            "p_bn1": init_bn(dim),
            "conv1": init_conv2d(pg, 1, dim, dim),
            "bn1": init_bn(dim),
            "conv2": init_convolution(pg, 3, dim, dim)}


def apply_pool(p, x, pool1, pool2):
    p1 = pool1(apply_convolution(p["p1_conv1"], x))
    p2 = pool2(apply_convolution(p["p2_conv1"], x))
    C = p1.shape[-1]
    ones = jnp.ones((C,), jnp.float32)
    zeros = jnp.zeros((C,), jnp.float32)
    p12 = affine2_add(p1, ones, zeros, p2, ones, zeros, relu=False)
    pc = conv2d(p12, p["p_conv1"]["w"], p["p_conv1"]["b"])
    spc, tpc = bn_scale_shift(pc, p["p_bn1"]["gamma"], p["p_bn1"]["beta"])
    c1 = conv2d(x, p["conv1"]["w"], p["conv1"]["b"])
    sc1, tc1 = bn_scale_shift(c1, p["bn1"]["gamma"], p["bn1"]["beta"])
    r1 = affine2_add(pc, spc, tpc, c1, sc1, tc1, relu=True)
    return apply_convolution(p["conv2"], r1)


# --- prediction heads, batched per corner: one 256->768 3x3 conv (heat|tag|regr
#     trunks concatenated along Cout) + one block-diagonal 768->83 1x1 conv ---
def init_corner_heads(pg, cin, mid, couts=(80, 1, 2)):
    w3 = jnp.concatenate([pg.conv_w(3, cin, mid) for _ in couts], axis=3)
    b3 = jnp.zeros((mid * len(couts),), jnp.float32)
    total = int(sum(couts))
    w1 = jnp.zeros((mid * len(couts), total), jnp.float32)
    col = 0
    for i, co in enumerate(couts):
        wi = pg.conv_w(1, mid, co).astype(jnp.float32).reshape(mid, co)
        w1 = w1.at[i * mid:(i + 1) * mid, col:col + co].set(wi)
        col += co
    return {"w3": w3, "b3": b3,
            "w1": w1.reshape(1, 1, mid * len(couts), total).astype(jnp.bfloat16),
            "b1": jnp.zeros((total,), jnp.float32),
            "couts": couts}


def apply_corner_heads(ph, x):
    y = conv2d(x, ph["w3"], ph["b3"], relu=True)     # batched 3x3 trunks (with_bn=False)
    z = conv2d(y, ph["w1"], ph["b1"], relu=False)    # block-diagonal 1x1 outputs
    heat = z[..., 0:80]
    tag = z[..., 80:81]
    regr = z[..., 81:83]
    return heat, tag, regr


# --- 1x1 conv + BN blocks (inters_, cnvs_) ---
def init_conv_bn(pg, cin, cout):
    return {"conv": init_conv2d(pg, 1, cin, cout), "bn": init_bn(cout)}


# ======================= full Model =======================

def init_model(seed=0):
    pg = ParamGen(seed)
    p = {}
    p["pre"] = {"conv": init_convolution(pg, 7, 3, 128),          # stride 2
                "res": init_residual(pg, 3, 128, 256, stride=2)}  # stride 2
    hg = init_hourglass(pg, n_levels, in_channels, modules_cfg)
    p["kps"] = [hg for _ in range(nstack)]  # the PyTorch code reuses one hourglass instance
    p["cnvs"] = [init_convolution(pg, 3, in_channels[0], cnv_dim) for _ in range(nstack)]
    p["tl_cnvs"] = [init_pool(pg, cnv_dim) for _ in range(nstack)]
    p["br_cnvs"] = [init_pool(pg, cnv_dim) for _ in range(nstack)]
    p["tl_heads"] = [init_corner_heads(pg, cnv_dim, in_channels[0]) for _ in range(nstack)]
    p["br_heads"] = [init_corner_heads(pg, cnv_dim, in_channels[0]) for _ in range(nstack)]
    p["inters"] = [init_residual(pg, 3, in_channels[0], in_channels[0]) for _ in range(nstack - 1)]
    p["inters_"] = [init_conv_bn(pg, in_channels[0], in_channels[0]) for _ in range(nstack - 1)]
    p["cnvs_"] = [init_conv_bn(pg, cnv_dim, in_channels[0]) for _ in range(nstack - 1)]
    return p


def model_forward(p, x_nchw):
    x = jnp.transpose(x_nchw, (0, 2, 3, 1)).astype(jnp.float32)   # NCHW -> NHWC
    inter = apply_convolution(p["pre"]["conv"], x, stride=2)
    inter = apply_residual(p["pre"]["res"], inter)
    outs = []
    for ind in range(nstack):
        kp = apply_hourglass(p["kps"][ind], inter)
        cnv = apply_convolution(p["cnvs"][ind], kp)
        if ind == nstack - 1:
            tl_cnv = apply_pool(p["tl_cnvs"][ind], cnv, top_pooling, left_pooling)
            br_cnv = apply_pool(p["br_cnvs"][ind], cnv, bottom_pooling, right_pooling)
            tl_heat, tl_tag, tl_regr = apply_corner_heads(p["tl_heads"][ind], tl_cnv)
            br_heat, br_tag, br_regr = apply_corner_heads(p["br_heads"][ind], br_cnv)
            outs += [tl_heat, br_heat, tl_tag, br_tag, tl_regr, br_regr]
        if ind < nstack - 1:
            a = conv2d(inter, p["inters_"][ind]["conv"]["w"], p["inters_"][ind]["conv"]["b"])
            sa, ta = bn_scale_shift(a, p["inters_"][ind]["bn"]["gamma"],
                                    p["inters_"][ind]["bn"]["beta"])
            b = conv2d(cnv, p["cnvs_"][ind]["conv"]["w"], p["cnvs_"][ind]["conv"]["b"])
            sb_, tb_ = bn_scale_shift(b, p["cnvs_"][ind]["bn"]["gamma"],
                                      p["cnvs_"][ind]["bn"]["beta"])
            inter = affine2_add(a, sa, ta, b, sb_, tb_, relu=True)
            inter = apply_residual(p["inters"][ind], inter)
    # transpose heads back to PyTorch NCHW layout
    return [jnp.transpose(o, (0, 3, 1, 2)) for o in outs]


if __name__ == "__main__":
    params = init_model(seed=0)
    key = jax.random.PRNGKey(0)
    # smallest input compatible with 2x stride-2 pre + 5 hourglass downsamples: 128x128
    x = jax.random.normal(key, (1, 3, 128, 128), dtype=jnp.float32)
    outs = model_forward(params, x)
    outs = jax.block_until_ready(outs)
    expected_c = [80, 80, 1, 1, 2, 2]
    assert len(outs) == 6
    for o, c in zip(outs, expected_c):
        assert o.shape == (1, c, 32, 32), o.shape
        assert bool(jnp.all(jnp.isfinite(o)))
    print("KERNEL_OK")
</pallas_src>

<mosaic_0001>
module attributes {stable_mosaic.version = 11 : i64} {
  func.func @_conv_kernel(%arg0: i32, %arg1: i32, %arg2: i32, %arg3: memref<1x1x64x64x147xbf16, #tpu.memory_space<vmem>>, %arg4: memref<1x147x128xbf16, #tpu.memory_space<vmem>>, %arg5: memref<1x128xf32, #tpu.memory_space<vmem>>, %arg6: memref<1x8x64x128xf32, #tpu.memory_space<vmem>>) attributes {dimension_semantics = [#tpu.dimension_semantics<parallel>, #tpu.dimension_semantics<parallel>, #tpu.dimension_semantics<arbitrary>], iteration_bounds = array<i64: 1, 1, 8>, scalar_prefetch = 0 : i64, scratch_operands = 0 : i64, tpu.core_type = #tpu.core_type<tc>, window_params = [{transform_indices = @transform_0, window_bounds = array<i64: 1, 1, 64, 64, 147>}, {transform_indices = @transform_1, window_bounds = array<i64: 1, 147, 128>}, {transform_indices = @transform_2, window_bounds = array<i64: 1, 128>}, {transform_indices = @transform_3, window_bounds = array<i64: 1, 8, 64, 128>}]} {
    %c8_i32 = arith.constant 8 : i32
    %0 = arith.muli %arg2, %c8_i32 : i32
    %c0 = arith.constant 0 : index
    %c0_0 = arith.constant 0 : index
    %1 = vector.load %arg5[%c0, %c0_0] : memref<1x128xf32, #tpu.memory_space<vmem>>, vector<1x128xf32>
    %cst = arith.constant 0.000000e+00 : f32
    %2 = vector.broadcast %cst : f32 to vector<512x128xf32>
    %c0_i32 = arith.constant 0 : i32
    %3 = arith.addi %0, %c0_i32 : i32
    %c0_1 = arith.constant 0 : index
    %c0_2 = arith.constant 0 : index
    %4 = arith.index_cast %3 : i32 to index
    %c0_3 = arith.constant 0 : index
    %c0_4 = arith.constant 0 : index
    %5 = vector.load %arg3[%c0_1, %c0_2, %4, %c0_3, %c0_4] : memref<1x1x64x64x147xbf16, #tpu.memory_space<vmem>>, vector<1x1x8x64x147xbf16>
    %6 = vector.shape_cast %5 : vector<1x1x8x64x147xbf16> to vector<8x64x147xbf16>
    %7 = vector.shape_cast %6 : vector<8x64x147xbf16> to vector<512x147xbf16>
    %c0_5 = arith.constant 0 : index
    %c0_6 = arith.constant 0 : index
    %c0_7 = arith.constant 0 : index
    %8 = vector.load %arg4[%c0_5, %c0_6, %c0_7] : memref<1x147x128xbf16, #tpu.memory_space<vmem>>, vector<1x147x128xbf16>
    %9 = vector.shape_cast %8 : vector<1x147x128xbf16> to vector<147x128xbf16>
    %cst_8 = arith.constant dense<0.000000e+00> : vector<512x128xf32>
    %10 = tpu.matmul %7, %9, %cst_8 {dimension_numbers = #tpu.dot_dimension_numbers<[1], [0], [0], [1], [0, 0, 1, 1], [], []>} : vector<512x147xbf16>, vector<147x128xbf16>, vector<512x128xf32> -> vector<512x128xf32>
    %11 = arith.addf %2, %10 : vector<512x128xf32>
    %12 = vector.broadcast %1 : vector<1x128xf32> to vector<512x128xf32>
    %13 = arith.addf %11, %12 : vector<512x128xf32>
    %14 = vector.shape_cast %13 : vector<512x128xf32> to vector<1x8x64x128xf32>
    %c0_9 = arith.constant 0 : index
    %c0_10 = arith.constant 0 : index
    %c0_11 = arith.constant 0 : index
    %c0_12 = arith.constant 0 : index
    %15 = vector.load %arg6[%c0_9, %c0_10, %c0_11, %c0_12] : memref<1x8x64x128xf32, #tpu.memory_space<vmem>>, vector<1x8x64x128xf32>
    tpu.vector_store %arg6[%c0_9, %c0_10, %c0_11, %c0_12], %14 {strides = array<i32>} : memref<1x8x64x128xf32, #tpu.memory_space<vmem>>, vector<1x8x64x128xf32>,
    return
  }
  func.func @transform_0(%arg0: i32, %arg1: i32, %arg2: i32) -> (i32, i32, i32, i32, i32) {
    %c0_i32 = arith.constant 0 : i32
    %c0_i32_0 = arith.constant 0 : i32
    %c0_i32_1 = arith.constant 0 : i32
    %c0_i32_2 = arith.constant 0 : i32
    %c0_i32_3 = arith.constant 0 : i32
    return %arg0, %c0_i32, %c0_i32_0, %c0_i32_1, %c0_i32_2 : i32, i32, i32, i32, i32
  }
  func.func @transform_1(%arg0: i32, %arg1: i32, %arg2: i32) -> (i32, i32, i32) {
    %c0_i32 = arith.constant 0 : i32
    %c0_i32_0 = arith.constant 0 : i32
    %c0_i32_1 = arith.constant 0 : i32
    return %c0_i32, %c0_i32_0, %arg1 : i32, i32, i32
  }
  func.func @transform_2(%arg0: i32, %arg1: i32, %arg2: i32) -> (i32, i32) {
    %c0_i32 = arith.constant 0 : i32
    %c0_i32_0 = arith.constant 0 : i32
    return %c0_i32, %arg1 : i32, i32
  }
  func.func @transform_3(%arg0: i32, %arg1: i32, %arg2: i32) -> (i32, i32, i32, i32) {
    %c0_i32 = arith.constant 0 : i32
    %c0_i32_0 = arith.constant 0 : i32
    return %arg0, %arg2, %c0_i32, %arg1 : i32, i32, i32, i32
  }
}

</mosaic_0001>

<bundles_post_ra>
// kernel: conv2d.1
= control target key start
LH: loop header
LB: loop body
LE: loop exit
PB: predicated region body
PF: predicated region fallthrough
CT: control target
= control target key end

     0   :  { %8 = vsyncpa [#allocation3], 0  ;;  %s2048_s0 = inlined_call_operand.vmem [shape: bf16[1,1,64,64,147], index: 0, kind: input, shape index: {}]   ;;  %s2049_s1 = inlined_call_operand.vmem [shape: bf16[1,147,128], index: 1, kind: input, shape index: {}]   ;;  %s2050_s2 = inlined_call_operand.vmem [shape: f32[1,128], index: 2, kind: input, shape index: {}]   ;;  %s2051_s3 = inlined_call_operand.hbm [shape: f32[1,64,64,128], index: 3, kind: output, shape index: {}]  }
   0x1   :  { %10 = vsyncpa [#allocation3 + $0x1], 0  ;;  %s1666_s12 = smov 0   ;;  %s1668_s13 = smov 0  }
   0x2   :  { %s1670_s14 = smov 0   ;;  %s1672_s15 = smov 0  }
   0x3   :  { %s1674_s16 = smov 0   ;;  %s1676_s17 = smov 0  }
   0x4 LB: > { %s1248_s18 = sadd.s32 4294967295, %s1639_s17   ;;  %s1249_s19 = sadd.s32 4294967294, %s1639_s17   ;;  %s1639_s17 = sphi %s1676_s17, %s16_s17   ;;  %s1635_s16 = sphi %s1674_s16, %s2058_s16   ;;  %s1631_s15 = sphi %s1672_s15, %s2057_s15   ;;  %s1627_s14 = sphi %s1670_s14, %s2056_s14   ;;  %s1623_s13 = sphi %s1668_s13, %s2055_s13   ;;  %s1619_s12 = sphi %s1666_s12, %s2054_s12  }
   0x5   : > { %s28_s20 = sadd.s32 1, %s1635_s16  ;;  %s124_s21 = sadd.s32 1, %s1627_s14 }
   0x6   : > { %p29_p0 = scmp.ge.s32.totalorder %s28_s20, 8  ;;  %p134_p1 = scmp.ne.s32.totalorder %s1627_s14, %s1623_s13 }
   0x7   : > { %p135_p2 = scmp.eq.s32.totalorder %s1248_s18, 7  ;;  %p140_p3 = scmp.ne.s32.totalorder %s1623_s13, %s1619_s12 }
   0x8   : > { %s2060_s20 = smov (%p29_p0, %s28_s20), 0  ;;  %p141_p5 = scmp.eq.s32.totalorder %s1249_s19, 7 }
   0x9   : > { %p1706_p4 = por %p135_p2, %p134_p1  ;;  %s118_s23 = ssub.s32 %s1635_s16, %s2060_s20 }
   0xa   : > { %p1254_p6 = scmp.ge.s32.totalorder %s1639_s17, 1  ;;  %p122_p7 = scmp.eq.s32.totalorder %s118_s23, 0 }
   0xb   : > { %p1713_p8 = por %p141_p5, %p140_p3  ;;  %p180_p9 = scmp.lt.s32.totalorder %s1639_s17, 9 }
   0xc   : > { %s1719_s25 = scalar_select %p122_p7, %s1627_s14, %s124_s21  }
   0xd   : > { %p181_p10 = pnand %p1254_p6, %p180_p9 }
   0xe   : > { %v1455_v0 = vld [vmem:[%s2049_s1] sm:$0xff] (!%p181_p10)   ;;  %v1641_v1 = vmov (!%p181_p10), 0   ;;  %v1456_v2 = vld [vmem:[%s2049_s1 + $0x8] sm:$0xff] (!%p181_p10)   ;;  %v1457_v3 = vld [vmem:[%s2049_s1 + $0x10] sm:$0xff] (!%p181_p10)   ;;  %s1373_s5 = sshll.u32 (!%p181_p10), %s1631_s15, 9  ;;  %vm664_vm0 = vcmask (!%p181_p10), 154624  }
   0xf   : > { %184 = sbr.rel (%p181_p10) target bundleno = 406 (0x196), region = 32  ;;  %768 = vmatprep.subr.bf16.mxu0 (!%p181_p10), %v1641_v1  ;;  %1376 = vmatprep.subr.bf16.mxu1 (!%p181_p10), %v1641_v1  ;;  %s1734_s8 = scalar_lea.vmem (!%p181_p10), %s2048_s0, %s1373_s5  ;;  %v1458_v4 = vld [vmem:[%s2049_s1 + $0x18] sm:$0xff] (!%p181_p10)   ;;  %v1459_v7 = vld [vmem:[%s2049_s1 + $0x20] sm:$0xff] (!%p181_p10)   ;;  %v1460_v8 = vld [vmem:[%s2049_s1 + $0x28] sm:$0xff] (!%p181_p10)   ;;  %vm761_vm1 = vcmask (!%p181_p10), 1040384   ;;  %vm762_vm2 = vcmask (!%p181_p10), 1041408  }
  0x10   : > { %769 = vmatpush1.bf16.msra.mxu0 (!%p181_p10), %v1455_v0  ;;  %1386 = vmatpush1.bf16.msra.mxu1 (!%p181_p10), %v1455_v0  ;;  %v1467_v5 = vld [vmem:[%s1734_s8 + $0x4] ss:$8 sps:$4 sm:$0xff] (!%p181_p10)   ;;  %v1461_v9 = vld [vmem:[%s2049_s1 + $0x30] sm:$0xff] (!%p181_p10)   ;;  %v1462_v10 = vld [vmem:[%s2049_s1 + $0x38] sm:$0xff] (!%p181_p10)   ;;  %v1642_v11 = vmov (!%p181_p10), 65535   ;;  %s208_s6 = sand.u32 (!%p181_p10), 1, %s1623_s13  }
  0x11   : > { %770 = vmatprep.subr.bf16.mxu0 (!%p181_p10), %v1641_v1  ;;  %1377 = vmatprep.subr.bf16.mxu1 (!%p181_p10), %v1641_v1  ;;  %v1470_v6 = vld [vmem:[%s1734_s8 + $0x104] ss:$8 sps:$4 sm:$0xff] (!%p181_p10)   ;;  %v763_v12 = vsel (!%p181_p10), %vm761_vm1, 4294967295, %v1642_v11  ;;  %v1464_v14 = vld [vmem:[%s2049_s1 + $0x48] ss:$0 sps:$4 sm:$0x33] (!%p181_p10)  }
  0x12   : > { %1334 = vmatprep.mubr.msk.bf16.mxu0 (!%p181_p10), %vm664_vm0, %v1467_v5  ;;  %1350 = vmatprep.mubr.msk.bf16.mxu1 (!%p181_p10), %vm664_vm0, %v1470_v6  ;;  %v1463_v13 = vld [vmem:[%s2049_s1 + $0x40] sm:$0xff] (!%p181_p10)   ;;  %v764_v15 = vsel (!%p181_p10), %vm762_vm2, %v763_v12, 0  ;;  %v1471_v19 = vld [vmem:[%s1734_s8 + $0x14] ss:$8 sps:$4 sm:$0xff] (!%p181_p10)   ;;  %v1475_v21 = vld [vmem:[%s1734_s8 + $0x10] ss:$8 sps:$4 sm:$0xff] (!%p181_p10)  }
  0x13   : > { %v766_v16 = vand.u32 (!%p181_p10), %v1464_v14, %v764_v15  ;;  %v1465_v17 = vld [vmem:[%s1734_s8] ss:$8 sps:$4 sm:$0xff] (!%p181_p10)   ;;  %v1473_v20 = vld [vmem:[%s1734_s8 + $0x114] ss:$8 sps:$4 sm:$0xff] (!%p181_p10)   ;;  %v1476_v22 = vld [vmem:[%s1734_s8 + $0x110] ss:$8 sps:$4 sm:$0xff] (!%p181_p10)  }
  0x14   : > { %771 = vmatpush1.bf16.msra.mxu0 (!%p181_p10), %v1456_v2  ;;  %1387 = vmatpush1.bf16.msra.mxu1 (!%p181_p10), %v1456_v2  ;;  %v1468_v18 = vld [vmem:[%s1734_s8 + $0x100] ss:$8 sps:$4 sm:$0xff] (!%p181_p10)   ;;  %v1477_v23 = vld [vmem:[%s1734_s8 + $0x24] ss:$8 sps:$4 sm:$0xff] (!%p181_p10)   ;;  %v1483_v27 = vld [vmem:[%s1734_s8 + $0x34] ss:$8 sps:$4 sm:$0xff] (!%p181_p10)  }
  0x15   : > { %772 = vmatprep.subr.bf16.mxu0 (!%p181_p10), %v1641_v1  ;;  %1378 = vmatprep.subr.bf16.mxu1 (!%p181_p10), %v1641_v1  ;;  %v1479_v24 = vld [vmem:[%s1734_s8 + $0x124] ss:$8 sps:$4 sm:$0xff] (!%p181_p10)   ;;  %v1481_v25 = vld [vmem:[%s1734_s8 + $0x20] ss:$8 sps:$4 sm:$0xff] (!%p181_p10)   ;;  %v1485_v28 = vld [vmem:[%s1734_s8 + $0x134] ss:$8 sps:$4 sm:$0xff] (!%p181_p10)  }
  0x16   : > { %v1482_v26 = vld [vmem:[%s1734_s8 + $0x120] ss:$8 sps:$4 sm:$0xff]   ;;  %v1487_v29 = vld [vmem:[%s1734_s8 + $0x30] ss:$8 sps:$4 sm:$0xff]   ;;  %v1489_v31 = vld [vmem:[%s1734_s8 + $0x44] ss:$8 sps:$4 sm:$0xff]  }
  0x17   : > { %v1488_v30 = vld [vmem:[%s1734_s8 + $0x130] ss:$8 sps:$4 sm:$0xff]   ;;  %v1491_v32 = vld [vmem:[%s1734_s8 + $0x144] ss:$8 sps:$4 sm:$0xff]   ;;  %v1493_v33 = vld [vmem:[%s1734_s8 + $0x40] ss:$8 sps:$4 sm:$0xff]  }
  0x18   : > { %773 = vmatpush1.bf16.msra.mxu0 %v1457_v3  ;;  %1388 = vmatpush1.bf16.msra.mxu1 %v1457_v3  ;;  %v1494_v34 = vld [vmem:[%s1734_s8 + $0x140] ss:$8 sps:$4 sm:$0xff]   ;;  %v1495_v35 = vld [vmem:[%s1734_s8 + $0x54] ss:$8 sps:$4 sm:$0xff]   ;;  %v1499_v37 = vld [vmem:[%s1734_s8 + $0x50] ss:$8 sps:$4 sm:$0xff]  }
  0x19   : > { %774 = vmatprep.subr.bf16.mxu0 %v1641_v1  ;;  %1379 = vmatprep.subr.bf16.mxu1 %v1641_v1  ;;  %v1497_v36 = vld [vmem:[%s1734_s8 + $0x154] ss:$8 sps:$4 sm:$0xff]   ;;  %v1500_v38 = vld [vmem:[%s1734_s8 + $0x150] ss:$8 sps:$4 sm:$0xff]   ;;  %v1501_v39 = vld [vmem:[%s1734_s8 + $0x64] ss:$8 sps:$4 sm:$0xff]  }
  0x1a   : > { %v1503_v40 = vld [vmem:[%s1734_s8 + $0x164] ss:$8 sps:$4 sm:$0xff]   ;;  %v1505_v41 = vld [vmem:[%s1734_s8 + $0x60] ss:$8 sps:$4 sm:$0xff]   ;;  %v1507_v43 = vld [vmem:[%s1734_s8 + $0x74] ss:$8 sps:$4 sm:$0xff]  }
  0x1b   : > { %v1506_v42 = vld [vmem:[%s1734_s8 + $0x160] ss:$8 sps:$4 sm:$0xff]   ;;  %v1509_v44 = vld [vmem:[%s1734_s8 + $0x174] ss:$8 sps:$4 sm:$0xff]   ;;  %v1511_v45 = vld [vmem:[%s1734_s8 + $0x70] ss:$8 sps:$4 sm:$0xff]  }
  0x1c   : > { %775 = vmatpush1.bf16.msra.mxu0 %v1458_v4  ;;  %1389 = vmatpush1.bf16.msra.mxu1 %v1458_v4  ;;  %v1512_v46 = vld [vmem:[%s1734_s8 + $0x170] ss:$8 sps:$4 sm:$0xff]   ;;  %v1513_v47 = vld [vmem:[%s1734_s8 + $0x84] ss:$8 sps:$4 sm:$0xff]   ;;  %v1517_v49 = vld [vmem:[%s1734_s8 + $0x80] ss:$8 sps:$4 sm:$0xff]  }
  0x1d   : > { %776 = vmatprep.subr.bf16.mxu0 %v1641_v1  ;;  %1380 = vmatprep.subr.bf16.mxu1 %v1641_v1  ;;  %v1515_v48 = vld [vmem:[%s1734_s8 + $0x184] ss:$8 sps:$4 sm:$0xff]   ;;  %v1518_v50 = vld [vmem:[%s1734_s8 + $0x180] ss:$8 sps:$4 sm:$0xff]   ;;  %v1519_v51 = vld [vmem:[%s1734_s8 + $0x94] ss:$8 sps:$4 sm:$0xff]  }
  0x1e   : > { %v1521_v52 = vld [vmem:[%s1734_s8 + $0x194] ss:$8 sps:$4 sm:$0xff]   ;;  %v1523_v53 = vld [vmem:[%s1734_s8 + $0x90] ss:$8 sps:$4 sm:$0xff]   ;;  %v1525_v55 = vld [vmem:[%s1734_s8 + $0xa4] ss:$8 sps:$4 sm:$0xff]  }
  0x1f   : > { %v1524_v54 = vld [vmem:[%s1734_s8 + $0x190] ss:$8 sps:$4 sm:$0xff]   ;;  %v1527_v56 = vld [vmem:[%s1734_s8 + $0x1a4] ss:$8 sps:$4 sm:$0xff]   ;;  %v1529_v57 = vld [vmem:[%s1734_s8 + $0xa0] ss:$8 sps:$4 sm:$0xff]  }
  0x20   : > { %777 = vmatpush1.bf16.msra.mxu0 %v1459_v7  ;;  %1390 = vmatpush1.bf16.msra.mxu1 %v1459_v7  ;;  %v1530_v58 = vld [vmem:[%s1734_s8 + $0x1a0] ss:$8 sps:$4 sm:$0xff]   ;;  %v1531_v59 = vld [vmem:[%s1734_s8 + $0xb4] ss:$8 sps:$4 sm:$0xff]   ;;  %v1535_v61 = vld [vmem:[%s1734_s8 + $0xb0] ss:$8 sps:$4 sm:$0xff]  }
  0x21   : > { %778 = vmatprep.subr.bf16.mxu0 %v1641_v1  ;;  %1381 = vmatprep.subr.bf16.mxu1 %v1641_v1  ;;  %v1533_v60 = vld [vmem:[%s1734_s8 + $0x1b4] ss:$8 sps:$4 sm:$0xff]   ;;  %v1536_v62 = vld [vmem:[%s1734_s8 + $0x1b0] ss:$8 sps:$4 sm:$0xff]   ;;  %v1537_v63 = vld [vmem:[%s1734_s8 + $0xc4] ss:$8 sps:$4 sm:$0xff]  }
  0x22   : > { %v1539_v0 = vld [vmem:[%s1734_s8 + $0x1c4] ss:$8 sps:$4 sm:$0xff]   ;;  %v1542_v2 = vld [vmem:[%s1734_s8 + $0x1c0] ss:$8 sps:$4 sm:$0xff]   ;;  %v1543_v3 = vld [vmem:[%s1734_s8 + $0xd4] ss:$8 sps:$4 sm:$0xff]  }
  0x23   : > { %v1545_v4 = vld [vmem:[%s1734_s8 + $0x1d4] ss:$8 sps:$4 sm:$0xff]   ;;  %v1547_v5 = vld [vmem:[%s1734_s8 + $0xd0] ss:$8 sps:$4 sm:$0xff]   ;;  %v1549_v7 = vld [vmem:[%s1734_s8 + $0xe4] ss:$8 sps:$4 sm:$0xff]  }
  0x24   : > { %779 = vmatpush1.bf16.msra.mxu0 %v1460_v8  ;;  %1391 = vmatpush1.bf16.msra.mxu1 %v1460_v8  ;;  %v1548_v6 = vld [vmem:[%s1734_s8 + $0x1d0] ss:$8 sps:$4 sm:$0xff]   ;;  %v1551_v8 = vld [vmem:[%s1734_s8 + $0x1e4] ss:$8 sps:$4 sm:$0xff]   ;;  %v1555_v11 = vld [vmem:[%s1734_s8 + $0xf4] ss:$8 sps:$4 sm:$0xff]  }
  0x25   : > { %780 = vmatprep.subr.bf16.mxu0 %v1641_v1  ;;  %1382 = vmatprep.subr.bf16.mxu1 %v1641_v1  ;;  %v1557_v12 = vld [vmem:[%s1734_s8 + $0x1f4] ss:$8 sps:$4 sm:$0xff]   ;;  %v1560_v14 = vld [vmem:[%s1734_s8 + $0x1f0] ss:$8 sps:$4 sm:$0xff]   ;;  %s1255_s7 = sshll.u32 %s208_s6, 9  ;;  %s1375_s11 = sshll.u32 %s1631_s15, 13 }
  0x26   : > { %v1859_v15 = vld [vmem:[%s2050_s2] ss:$0 sm:$0xff]  ;;  %s1990_s23 = scalar_lea.hbm %s2051_s3, %s1375_s11  ;;  %s2002_s15 = scalar_lea.sflag [#allocation3], %s208_s6 }
  0x27   : > { %s1643_s27 = smov [#allocation2]  }
  0x28   : > { %781 = vmatpush1.bf16.msra.mxu0 %v1461_v9  ;;  %1392 = vmatpush1.bf16.msra.mxu1 %v1461_v9  ;;  %v1553_v9 = vld [vmem:[%s1734_s8 + $0xe0] ss:$8 sps:$4 sm:$0xff]   ;;  %s1565_s28 = sshll.u32 %s1643_s27, 4  ;;  %s1566_s28 = int_to_ptr.vmem [resolvable:$false] %s1565_s28 }
  0x29   : > { %782 = vmatprep.subr.bf16.mxu0 %v1641_v1  ;;  %1383 = vmatprep.subr.bf16.mxu1 %v1641_v1  ;;  %s1567_s29 = scalar_lea.vmem %s1566_s28, 16384 }
  0x2c   : > { %783 = vmatpush1.bf16.msra.mxu0 %v1462_v10  ;;  %1393 = vmatpush1.bf16.msra.mxu1 %v1462_v10  ;;  %v1554_v10 = vld [vmem:[%s1734_s8 + $0x1e0] ss:$8 sps:$4 sm:$0xff]  }
  0x2d   : > { %784 = vmatprep.subr.bf16.mxu0 %v1641_v1  ;;  %1384 = vmatprep.subr.bf16.mxu1 %v1641_v1 }
  0x30   : > { %785 = vmatpush1.bf16.msra.mxu0 %v1463_v13  ;;  %1394 = vmatpush1.bf16.msra.mxu1 %v1463_v13  ;;  %v1559_v13 = vld [vmem:[%s1734_s8 + $0xf0] ss:$8 sps:$4 sm:$0xff]  }
  0x31   : > { %786 = vmatprep.subr.bf16.mxu0 %v1641_v1  ;;  %1385 = vmatprep.subr.bf16.mxu1 %v1641_v1  ;;  %v1541_v1 = vld [vmem:[%s1734_s8 + $0xc0] ss:$8 sps:$4 sm:$0xff]   ;;  %s1863_s8 = scalar_lea.vmem [#allocation2], %s1255_s7 }
  0x32   : > { %s1139_s18 = sshll.u32 %s1863_s8, 4  ;;  %s1992_s18 = int_to_ptr.vmem [resolvable:$true] %s1139_s18 }
  0x33   : > { %s1561_s26 = scalar_lea.vmem %s1992_s18, 8192  ;;  %p1568_p0 = scmp.lt.s32.totalorder %s1992_s18, %s1566_s28 }
  0x34   : > { %787 = vmatpush1.bf16.msra.mxu0 %v766_v16  ;;  %1395 = vmatpush1.bf16.msra.mxu1 %v766_v16  ;;  %p1562_p11 = scmp.ne.s32.totalorder %s1992_s18, %s1561_s26  ;;  %p1569_p1 = scmp.lt.s32.totalorder %s1567_s29, %s1561_s26 }
  0x36   : > { %p1563_p12 = pnand %p1562_p11, %p1706_p4  ;;  %p1570_p2 = por %p1569_p1, %p1568_p0 }
  0x37   : > { %801 = vmatmul.mubr.bf16.vlgmr.msra.gmra.mrb[0].mxu0 %v1465_v17  ;;  %929 = vmatmul.mubr.bf16.vlgmr.msra.gmra.mrb[0].mxu1 %v1468_v18 }
  0x38   : > { %1335 = vmatprep.mubr.msk.bf16.mxu0 %vm664_vm0, %v1471_v19  ;;  %1351 = vmatprep.mubr.msk.bf16.mxu1 %vm664_vm0, %v1473_v20  ;;  %p1564_p13 = pneg %p1563_p12 }
  0x3a   : > { %p1571_p3 = pnand %p1570_p2, %p1564_p13 }
  0x3f   : > { %809 = vmatmul.mubr.bf16.gmra.mrb[4].mxu0 %v1475_v21  ;;  %937 = vmatmul.mubr.bf16.gmra.mrb[4].mxu1 %v1476_v22 }
  0x40   : > { %1336 = vmatprep.mubr.msk.bf16.mxu0 %vm664_vm0, %v1477_v23  ;;  %1352 = vmatprep.mubr.msk.bf16.mxu1 %vm664_vm0, %v1479_v24 }
  0x47   : > { %817 = vmatmul.mubr.bf16.gmra.mrb[8].mxu0 %v1481_v25  ;;  %945 = vmatmul.mubr.bf16.gmra.mrb[8].mxu1 %v1482_v26 }
  0x48   : > { %1337 = vmatprep.mubr.msk.bf16.mxu0 %vm664_vm0, %v1483_v27  ;;  %1353 = vmatprep.mubr.msk.bf16.mxu1 %vm664_vm0, %v1485_v28 }
  0x4f   : > { %825 = vmatmul.mubr.bf16.gmra.mrb[12].mxu0 %v1487_v29  ;;  %953 = vmatmul.mubr.bf16.gmra.mrb[12].mxu1 %v1488_v30 }
  0x50   : > { %1338 = vmatprep.mubr.msk.bf16.mxu0 %vm664_vm0, %v1489_v31  ;;  %1354 = vmatprep.mubr.msk.bf16.mxu1 %vm664_vm0, %v1491_v32 }
  0x57   : > { %833 = vmatmul.mubr.bf16.gmra.mrb[16].mxu0 %v1493_v33  ;;  %961 = vmatmul.mubr.bf16.gmra.mrb[16].mxu1 %v1494_v34 }
  0x58   : > { %1339 = vmatprep.mubr.msk.bf16.mxu0 %vm664_vm0, %v1495_v35  ;;  %1355 = vmatprep.mubr.msk.bf16.mxu1 %vm664_vm0, %v1497_v36 }
  0x5f   : > { %841 = vmatmul.mubr.bf16.gmra.mrb[20].mxu0 %v1499_v37  ;;  %969 = vmatmul.mubr.bf16.gmra.mrb[20].mxu1 %v1500_v38 }
  0x60   : > { %1340 = vmatprep.mubr.msk.bf16.mxu0 %vm664_vm0, %v1501_v39  ;;  %1356 = vmatprep.mubr.msk.bf16.mxu1 %vm664_vm0, %v1503_v40 }
  0x67   : > { %849 = vmatmul.mubr.bf16.gmra.mrb[24].mxu0 %v1505_v41  ;;  %977 = vmatmul.mubr.bf16.gmra.mrb[24].mxu1 %v1506_v42 }
  0x68   : > { %1341 = vmatprep.mubr.msk.bf16.mxu0 %vm664_vm0, %v1507_v43  ;;  %1357 = vmatprep.mubr.msk.bf16.mxu1 %vm664_vm0, %v1509_v44 }
  0x6f   : > { %857 = vmatmul.mubr.bf16.gmra.mrb[28].mxu0 %v1511_v45  ;;  %985 = vmatmul.mubr.bf16.gmra.mrb[28].mxu1 %v1512_v46 }
  0x70   : > { %1342 = vmatprep.mubr.msk.bf16.mxu0 %vm664_vm0, %v1513_v47  ;;  %1358 = vmatprep.mubr.msk.bf16.mxu1 %vm664_vm0, %v1515_v48 }
  0x77   : > { %865 = vmatmul.mubr.bf16.gmra.mrb[32].mxu0 %v1517_v49  ;;  %993 = vmatmul.mubr.bf16.gmra.mrb[32].mxu1 %v1518_v50 }
  0x78   : > { %1343 = vmatprep.mubr.msk.bf16.mxu0 %vm664_vm0, %v1519_v51  ;;  %1359 = vmatprep.mubr.msk.bf16.mxu1 %vm664_vm0, %v1521_v52 }
  0x7f   : > { %873 = vmatmul.mubr.bf16.gmra.mrb[36].mxu0 %v1523_v53  ;;  %1001 = vmatmul.mubr.bf16.gmra.mrb[36].mxu1 %v1524_v54 }
  0x80   : > { %1344 = vmatprep.mubr.msk.bf16.mxu0 %vm664_vm0, %v1525_v55  ;;  %1360 = vmatprep.mubr.msk.bf16.mxu1 %vm664_vm0, %v1527_v56 }
  0x87   : > { %881 = vmatmul.mubr.bf16.gmra.mrb[40].mxu0 %v1529_v57  ;;  %1009 = vmatmul.mubr.bf16.gmra.mrb[40].mxu1 %v1530_v58 }
  0x88   : > { %1345 = vmatprep.mubr.msk.bf16.mxu0 %vm664_vm0, %v1531_v59  ;;  %1361 = vmatprep.mubr.msk.bf16.mxu1 %vm664_vm0, %v1533_v60 }
  0x8f   : > { %889 = vmatmul.mubr.bf16.gmra.mrb[44].mxu0 %v1535_v61  ;;  %1017 = vmatmul.mubr.bf16.gmra.mrb[44].mxu1 %v1536_v62 }
  0x90   : > { %1346 = vmatprep.mubr.msk.bf16.mxu0 %vm664_vm0, %v1537_v63  ;;  %1362 = vmatprep.mubr.msk.bf16.mxu1 %vm664_vm0, %v1539_v0 }
  0x97   : > { %897 = vmatmul.mubr.bf16.gmra.mrb[48].mxu0 %v1541_v1  ;;  %1025 = vmatmul.mubr.bf16.gmra.mrb[48].mxu1 %v1542_v2 }
  0x98   : > { %1347 = vmatprep.mubr.msk.bf16.mxu0 %vm664_vm0, %v1543_v3  ;;  %1363 = vmatprep.mubr.msk.bf16.mxu1 %vm664_vm0, %v1545_v4 }
  0x9f   : > { %905 = vmatmul.mubr.bf16.gmra.mrb[52].mxu0 %v1547_v5  ;;  %1033 = vmatmul.mubr.bf16.gmra.mrb[52].mxu1 %v1548_v6 }
  0xa0   : > { %1348 = vmatprep.mubr.msk.bf16.mxu0 %vm664_vm0, %v1549_v7  ;;  %1364 = vmatprep.mubr.msk.bf16.mxu1 %vm664_vm0, %v1551_v8 }
  0xa7   : > { %913 = vmatmul.mubr.bf16.gmra.mrb[56].mxu0 %v1553_v9  ;;  %1041 = vmatmul.mubr.bf16.gmra.mrb[56].mxu1 %v1554_v10 }
  0xa8   : > { %1349 = vmatprep.mubr.msk.bf16.mxu0 %vm664_vm0, %v1555_v11  ;;  %1365 = vmatprep.mubr.msk.bf16.mxu1 %vm664_vm0, %v1557_v12 }
  0xaf   : > { %921 = vmatmul.mubr.bf16.gmra.mrb[60].mxu0 %v1559_v13  ;;  %1049 = vmatmul.mubr.bf16.gmra.mrb[60].mxu1 %v1560_v14 }
 0x10a   : > { %v802_v16 = vpop.f32.mrb[0].mxu0  ;;  %v930_v17 = vpop.f32.mrb[0].mxu1 }
 0x10b   : > { %v803_v18 = vadd.f32 %v1859_v15, %v802_v16  ;;  %v931_v19 = vadd.f32 %v1859_v15, %v930_v17  ;;  %v804_v20 = vpop.f32.mrb[1].mxu0  ;;  %v932_v21 = vpop.f32.mrb[1].mxu1 }
 0x10c   : > { %v805_v22 = vpop.f32.mrb[2].mxu0  ;;  %v933_v23 = vpop.f32.mrb[2].mxu1 }
 0x10d   : > { %1057 = vst [vmem:[%s1863_s8] sm:$0xff] %v803_v18  ;;  %1089 = vst [vmem:[%s1863_s8 + $0x100] sm:$0xff] %v931_v19  ;;  %v806_v24 = vadd.f32 %v1859_v15, %v805_v22  ;;  %v934_v25 = vadd.f32 %v1859_v15, %v933_v23  ;;  %v807_v26 = vpop.f32.mrb[3].mxu0  ;;  %v935_v27 = vpop.f32.mrb[3].mxu1 }
 0x10f   : > { %1058 = vst [vmem:[%s1863_s8 + $0x8] sm:$0xff] %v806_v24  ;;  %1090 = vst [vmem:[%s1863_s8 + $0x108] sm:$0xff] %v934_v25 }
 0x112   : > { %v810_v28 = vpop.f32.mrb[4].mxu0  ;;  %v938_v29 = vpop.f32.mrb[4].mxu1 }
 0x113   : > { %v811_v30 = vadd.f32 %v1859_v15, %v810_v28  ;;  %v939_v31 = vadd.f32 %v1859_v15, %v938_v29  ;;  %v812_v32 = vpop.f32.mrb[5].mxu0  ;;  %v940_v33 = vpop.f32.mrb[5].mxu1 }
 0x114   : > { %v813_v34 = vpop.f32.mrb[6].mxu0  ;;  %v941_v35 = vpop.f32.mrb[6].mxu1 }
 0x115   : > { %1059 = vst [vmem:[%s1863_s8 + $0x10] sm:$0xff] %v811_v30  ;;  %1091 = vst [vmem:[%s1863_s8 + $0x110] sm:$0xff] %v939_v31  ;;  %v814_v36 = vadd.f32 %v1859_v15, %v813_v34  ;;  %v942_v37 = vadd.f32 %v1859_v15, %v941_v35  ;;  %v815_v38 = vpop.f32.mrb[7].mxu0  ;;  %v943_v39 = vpop.f32.mrb[7].mxu1 }
 0x117   : > { %1060 = vst [vmem:[%s1863_s8 + $0x18] sm:$0xff] %v814_v36  ;;  %1092 = vst [vmem:[%s1863_s8 + $0x118] sm:$0xff] %v942_v37 }
 0x11a   : > { %v818_v40 = vpop.f32.mrb[8].mxu0  ;;  %v946_v41 = vpop.f32.mrb[8].mxu1 }
 0x11b   : > { %v819_v42 = vadd.f32 %v1859_v15, %v818_v40  ;;  %v947_v43 = vadd.f32 %v1859_v15, %v946_v41  ;;  %v820_v44 = vpop.f32.mrb[9].mxu0  ;;  %v948_v45 = vpop.f32.mrb[9].mxu1 }
 0x11c   : > { %v821_v46 = vpop.f32.mrb[10].mxu0  ;;  %v949_v47 = vpop.f32.mrb[10].mxu1 }
 0x11d   : > { %1061 = vst [vmem:[%s1863_s8 + $0x20] sm:$0xff] %v819_v42  ;;  %1093 = vst [vmem:[%s1863_s8 + $0x120] sm:$0xff] %v947_v43  ;;  %v822_v48 = vadd.f32 %v1859_v15, %v821_v46  ;;  %v950_v49 = vadd.f32 %v1859_v15, %v949_v47  ;;  %v823_v50 = vpop.f32.mrb[11].mxu0  ;;  %v951_v51 = vpop.f32.mrb[11].mxu1 }
 0x11f   : > { %1062 = vst [vmem:[%s1863_s8 + $0x28] sm:$0xff] %v822_v48  ;;  %1094 = vst [vmem:[%s1863_s8 + $0x128] sm:$0xff] %v950_v49 }
 0x122   : > { %v826_v52 = vpop.f32.mrb[12].mxu0  ;;  %v954_v53 = vpop.f32.mrb[12].mxu1 }
 0x123   : > { %v827_v54 = vadd.f32 %v1859_v15, %v826_v52  ;;  %v955_v55 = vadd.f32 %v1859_v15, %v954_v53  ;;  %v828_v56 = vpop.f32.mrb[13].mxu0  ;;  %v956_v57 = vpop.f32.mrb[13].mxu1 }
 0x124   : > { %v829_v58 = vpop.f32.mrb[14].mxu0  ;;  %v957_v59 = vpop.f32.mrb[14].mxu1 }
 0x125   : > { %1063 = vst [vmem:[%s1863_s8 + $0x30] sm:$0xff] %v827_v54  ;;  %1095 = vst [vmem:[%s1863_s8 + $0x130] sm:$0xff] %v955_v55  ;;  %v830_v60 = vadd.f32 %v1859_v15, %v829_v58  ;;  %v958_v61 = vadd.f32 %v1859_v15, %v957_v59  ;;  %v831_v62 = vpop.f32.mrb[15].mxu0  ;;  %v959_v63 = vpop.f32.mrb[15].mxu1 }
 0x127   : > { %1064 = vst [vmem:[%s1863_s8 + $0x38] sm:$0xff] %v830_v60  ;;  %1096 = vst [vmem:[%s1863_s8 + $0x138] sm:$0xff] %v958_v61 }
 0x12a   : > { %v834_v0 = vpop.f32.mrb[16].mxu0  ;;  %v962_v1 = vpop.f32.mrb[16].mxu1 }
 0x12b   : > { %v835_v2 = vadd.f32 %v1859_v15, %v834_v0  ;;  %v963_v3 = vadd.f32 %v1859_v15, %v962_v1  ;;  %v836_v4 = vpop.f32.mrb[17].mxu0  ;;  %v964_v5 = vpop.f32.mrb[17].mxu1 }
 0x12c   : > { %v837_v6 = vpop.f32.mrb[18].mxu0  ;;  %v965_v7 = vpop.f32.mrb[18].mxu1 }
 0x12d   : > { %1065 = vst [vmem:[%s1863_s8 + $0x40] sm:$0xff] %v835_v2  ;;  %1097 = vst [vmem:[%s1863_s8 + $0x140] sm:$0xff] %v963_v3  ;;  %v838_v8 = vadd.f32 %v1859_v15, %v837_v6  ;;  %v966_v9 = vadd.f32 %v1859_v15, %v965_v7  ;;  %v839_v10 = vpop.f32.mrb[19].mxu0  ;;  %v967_v11 = vpop.f32.mrb[19].mxu1 }
 0x12f   : > { %1066 = vst [vmem:[%s1863_s8 + $0x48] sm:$0xff] %v838_v8  ;;  %1098 = vst [vmem:[%s1863_s8 + $0x148] sm:$0xff] %v966_v9 }
 0x132   : > { %v842_v12 = vpop.f32.mrb[20].mxu0  ;;  %v970_v13 = vpop.f32.mrb[20].mxu1 }
 0x133   : > { %v843_v14 = vadd.f32 %v1859_v15, %v842_v12  ;;  %v971_v16 = vadd.f32 %v1859_v15, %v970_v13  ;;  %v844_v17 = vpop.f32.mrb[21].mxu0  ;;  %v972_v18 = vpop.f32.mrb[21].mxu1 }
 0x134   : > { %v845_v19 = vpop.f32.mrb[22].mxu0  ;;  %v973_v20 = vpop.f32.mrb[22].mxu1 }
 0x135   : > { %1067 = vst [vmem:[%s1863_s8 + $0x50] sm:$0xff] %v843_v14  ;;  %1099 = vst [vmem:[%s1863_s8 + $0x150] sm:$0xff] %v971_v16  ;;  %v846_v21 = vadd.f32 %v1859_v15, %v845_v19  ;;  %v974_v22 = vadd.f32 %v1859_v15, %v973_v20  ;;  %v847_v23 = vpop.f32.mrb[23].mxu0  ;;  %v975_v24 = vpop.f32.mrb[23].mxu1 }
 0x137   : > { %1068 = vst [vmem:[%s1863_s8 + $0x58] sm:$0xff] %v846_v21  ;;  %1100 = vst [vmem:[%s1863_s8 + $0x158] sm:$0xff] %v974_v22 }
 0x13a   : > { %v850_v25 = vpop.f32.mrb[24].mxu0  ;;  %v978_v26 = vpop.f32.mrb[24].mxu1 }
 0x13b   : > { %v851_v27 = vadd.f32 %v1859_v15, %v850_v25  ;;  %v979_v28 = vadd.f32 %v1859_v15, %v978_v26  ;;  %v852_v29 = vpop.f32.mrb[25].mxu0  ;;  %v980_v30 = vpop.f32.mrb[25].mxu1 }
 0x13c   : > { %v853_v31 = vpop.f32.mrb[26].mxu0  ;;  %v981_v32 = vpop.f32.mrb[26].mxu1 }
 0x13d   : > { %1069 = vst [vmem:[%s1863_s8 + $0x60] sm:$0xff] %v851_v27  ;;  %1101 = vst [vmem:[%s1863_s8 + $0x160] sm:$0xff] %v979_v28  ;;  %v854_v33 = vadd.f32 %v1859_v15, %v853_v31  ;;  %v982_v34 = vadd.f32 %v1859_v15, %v981_v32  ;;  %v855_v35 = vpop.f32.mrb[27].mxu0  ;;  %v983_v36 = vpop.f32.mrb[27].mxu1 }
 0x13f   : > { %1070 = vst [vmem:[%s1863_s8 + $0x68] sm:$0xff] %v854_v33  ;;  %1102 = vst [vmem:[%s1863_s8 + $0x168] sm:$0xff] %v982_v34 }
 0x142   : > { %v858_v37 = vpop.f32.mrb[28].mxu0  ;;  %v986_v38 = vpop.f32.mrb[28].mxu1 }
 0x143   : > { %v859_v39 = vadd.f32 %v1859_v15, %v858_v37  ;;  %v987_v40 = vadd.f32 %v1859_v15, %v986_v38  ;;  %v860_v41 = vpop.f32.mrb[29].mxu0  ;;  %v988_v42 = vpop.f32.mrb[29].mxu1 }
 0x144   : > { %v861_v43 = vpop.f32.mrb[30].mxu0  ;;  %v989_v44 = vpop.f32.mrb[30].mxu1 }
 0x145   : > { %1071 = vst [vmem:[%s1863_s8 + $0x70] sm:$0xff] %v859_v39  ;;  %1103 = vst [vmem:[%s1863_s8 + $0x170] sm:$0xff] %v987_v40  ;;  %v862_v45 = vadd.f32 %v1859_v15, %v861_v43  ;;  %v990_v46 = vadd.f32 %v1859_v15, %v989_v44  ;;  %v863_v47 = vpop.f32.mrb[31].mxu0  ;;  %v991_v48 = vpop.f32.mrb[31].mxu1 }
 0x147   : > { %1072 = vst [vmem:[%s1863_s8 + $0x78] sm:$0xff] %v862_v45  ;;  %1104 = vst [vmem:[%s1863_s8 + $0x178] sm:$0xff] %v990_v46 }
 0x14a   : > { %v866_v49 = vpop.f32.mrb[32].mxu0  ;;  %v994_v50 = vpop.f32.mrb[32].mxu1 }
 0x14b   : > { %v867_v51 = vadd.f32 %v1859_v15, %v866_v49  ;;  %v995_v52 = vadd.f32 %v1859_v15, %v994_v50  ;;  %v868_v53 = vpop.f32.mrb[33].mxu0  ;;  %v996_v54 = vpop.f32.mrb[33].mxu1 }
 0x14c   : > { %v869_v55 = vpop.f32.mrb[34].mxu0  ;;  %v997_v56 = vpop.f32.mrb[34].mxu1 }
 0x14d   : > { %1073 = vst [vmem:[%s1863_s8 + $0x80] sm:$0xff] %v867_v51  ;;  %1105 = vst [vmem:[%s1863_s8 + $0x180] sm:$0xff] %v995_v52  ;;  %v870_v57 = vadd.f32 %v1859_v15, %v869_v55  ;;  %v998_v58 = vadd.f32 %v1859_v15, %v997_v56  ;;  %v871_v59 = vpop.f32.mrb[35].mxu0  ;;  %v999_v60 = vpop.f32.mrb[35].mxu1 }
 0x14f   : > { %1074 = vst [vmem:[%s1863_s8 + $0x88] sm:$0xff] %v870_v57  ;;  %1106 = vst [vmem:[%s1863_s8 + $0x188] sm:$0xff] %v998_v58 }
 0x152   : > { %v874_v61 = vpop.f32.mrb[36].mxu0  ;;  %v1002_v62 = vpop.f32.mrb[36].mxu1 }
 0x153   : > { %v875_v63 = vadd.f32 %v1859_v15, %v874_v61  ;;  %v1003_v0 = vadd.f32 %v1859_v15, %v1002_v62  ;;  %v876_v1 = vpop.f32.mrb[37].mxu0  ;;  %v1004_v2 = vpop.f32.mrb[37].mxu1 }
 0x154   : > { %v877_v3 = vpop.f32.mrb[38].mxu0  ;;  %v1005_v4 = vpop.f32.mrb[38].mxu1 }
 0x155   : > { %1075 = vst [vmem:[%s1863_s8 + $0x90] sm:$0xff] %v875_v63  ;;  %1107 = vst [vmem:[%s1863_s8 + $0x190] sm:$0xff] %v1003_v0  ;;  %v878_v5 = vadd.f32 %v1859_v15, %v877_v3  ;;  %v1006_v6 = vadd.f32 %v1859_v15, %v1005_v4  ;;  %v879_v7 = vpop.f32.mrb[39].mxu0  ;;  %v1007_v8 = vpop.f32.mrb[39].mxu1 }
 0x157   : > { %1076 = vst [vmem:[%s1863_s8 + $0x98] sm:$0xff] %v878_v5  ;;  %1108 = vst [vmem:[%s1863_s8 + $0x198] sm:$0xff] %v1006_v6 }
 0x15a   : > { %v882_v9 = vpop.f32.mrb[40].mxu0  ;;  %v1010_v10 = vpop.f32.mrb[40].mxu1 }
 0x15b   : > { %v883_v11 = vadd.f32 %v1859_v15, %v882_v9  ;;  %v1011_v12 = vadd.f32 %v1859_v15, %v1010_v10  ;;  %v884_v13 = vpop.f32.mrb[41].mxu0  ;;  %v1012_v14 = vpop.f32.mrb[41].mxu1 }
 0x15c   : > { %v885_v16 = vpop.f32.mrb[42].mxu0  ;;  %v1013_v17 = vpop.f32.mrb[42].mxu1 }
 0x15d   : > { %1077 = vst [vmem:[%s1863_s8 + $0xa0] sm:$0xff] %v883_v11  ;;  %1109 = vst [vmem:[%s1863_s8 + $0x1a0] sm:$0xff] %v1011_v12  ;;  %v886_v18 = vadd.f32 %v1859_v15, %v885_v16  ;;  %v1014_v19 = vadd.f32 %v1859_v15, %v1013_v17  ;;  %v887_v20 = vpop.f32.mrb[43].mxu0  ;;  %v1015_v21 = vpop.f32.mrb[43].mxu1 }
 0x15f   : > { %1078 = vst [vmem:[%s1863_s8 + $0xa8] sm:$0xff] %v886_v18  ;;  %1110 = vst [vmem:[%s1863_s8 + $0x1a8] sm:$0xff] %v1014_v19 }
 0x162   : > { %v890_v22 = vpop.f32.mrb[44].mxu0  ;;  %v1018_v23 = vpop.f32.mrb[44].mxu1 }
 0x163   : > { %v891_v24 = vadd.f32 %v1859_v15, %v890_v22  ;;  %v1019_v25 = vadd.f32 %v1859_v15, %v1018_v23  ;;  %v892_v26 = vpop.f32.mrb[45].mxu0  ;;  %v1020_v27 = vpop.f32.mrb[45].mxu1 }
 0x164   : > { %v893_v28 = vpop.f32.mrb[46].mxu0  ;;  %v1021_v29 = vpop.f32.mrb[46].mxu1 }
 0x165   : > { %1079 = vst [vmem:[%s1863_s8 + $0xb0] sm:$0xff] %v891_v24  ;;  %1111 = vst [vmem:[%s1863_s8 + $0x1b0] sm:$0xff] %v1019_v25  ;;  %v894_v30 = vadd.f32 %v1859_v15, %v893_v28  ;;  %v1022_v31 = vadd.f32 %v1859_v15, %v1021_v29  ;;  %v895_v32 = vpop.f32.mrb[47].mxu0  ;;  %v1023_v33 = vpop.f32.mrb[47].mxu1 }
 0x167   : > { %1080 = vst [vmem:[%s1863_s8 + $0xb8] sm:$0xff] %v894_v30  ;;  %1112 = vst [vmem:[%s1863_s8 + $0x1b8] sm:$0xff] %v1022_v31 }
 0x16a   : > { %v898_v34 = vpop.f32.mrb[48].mxu0  ;;  %v1026_v35 = vpop.f32.mrb[48].mxu1 }
 0x16b   : > { %v899_v36 = vadd.f32 %v1859_v15, %v898_v34  ;;  %v1027_v37 = vadd.f32 %v1859_v15, %v1026_v35  ;;  %v900_v38 = vpop.f32.mrb[49].mxu0  ;;  %v1028_v39 = vpop.f32.mrb[49].mxu1 }
 0x16c   : > { %v901_v40 = vpop.f32.mrb[50].mxu0  ;;  %v1029_v41 = vpop.f32.mrb[50].mxu1 }
 0x16d   : > { %1081 = vst [vmem:[%s1863_s8 + $0xc0] sm:$0xff] %v899_v36  ;;  %1113 = vst [vmem:[%s1863_s8 + $0x1c0] sm:$0xff] %v1027_v37  ;;  %v902_v42 = vadd.f32 %v1859_v15, %v901_v40  ;;  %v1030_v43 = vadd.f32 %v1859_v15, %v1029_v41  ;;  %v903_v44 = vpop.f32.mrb[51].mxu0  ;;  %v1031_v45 = vpop.f32.mrb[51].mxu1 }
 0x16f   : > { %1082 = vst [vmem:[%s1863_s8 + $0xc8] sm:$0xff] %v902_v42  ;;  %1114 = vst [vmem:[%s1863_s8 + $0x1c8] sm:$0xff] %v1030_v43 }
 0x172   : > { %v906_v46 = vpop.f32.mrb[52].mxu0  ;;  %v1034_v47 = vpop.f32.mrb[52].mxu1 }
 0x173   : > { %v907_v48 = vadd.f32 %v1859_v15, %v906_v46  ;;  %v1035_v49 = vadd.f32 %v1859_v15, %v1034_v47  ;;  %v908_v50 = vpop.f32.mrb[53].mxu0  ;;  %v1036_v51 = vpop.f32.mrb[53].mxu1 }
 0x174   : > { %v909_v52 = vpop.f32.mrb[54].mxu0  ;;  %v1037_v53 = vpop.f32.mrb[54].mxu1 }
 0x175   : > { %1083 = vst [vmem:[%s1863_s8 + $0xd0] sm:$0xff] %v907_v48  ;;  %1115 = vst [vmem:[%s1863_s8 + $0x1d0] sm:$0xff] %v1035_v49  ;;  %v910_v54 = vadd.f32 %v1859_v15, %v909_v52  ;;  %v1038_v55 = vadd.f32 %v1859_v15, %v1037_v53  ;;  %v911_v56 = vpop.f32.mrb[55].mxu0  ;;  %v1039_v57 = vpop.f32.mrb[55].mxu1 }
 0x177   : > { %1084 = vst [vmem:[%s1863_s8 + $0xd8] sm:$0xff] %v910_v54  ;;  %1116 = vst [vmem:[%s1863_s8 + $0x1d8] sm:$0xff] %v1038_v55 }
 0x17a   : > { %v914_v58 = vpop.f32.mrb[56].mxu0  ;;  %v1042_v59 = vpop.f32.mrb[56].mxu1 }
 0x17b   : > { %v915_v60 = vadd.f32 %v1859_v15, %v914_v58  ;;  %v1043_v61 = vadd.f32 %v1859_v15, %v1042_v59  ;;  %v916_v62 = vpop.f32.mrb[57].mxu0  ;;  %v1044_v63 = vpop.f32.mrb[57].mxu1 }
 0x17c   : > { %v917_v0 = vpop.f32.mrb[58].mxu0  ;;  %v1045_v1 = vpop.f32.mrb[58].mxu1 }
 0x17d   : > { %1085 = vst [vmem:[%s1863_s8 + $0xe0] sm:$0xff] %v915_v60  ;;  %1117 = vst [vmem:[%s1863_s8 + $0x1e0] sm:$0xff] %v1043_v61  ;;  %v918_v2 = vadd.f32 %v1859_v15, %v917_v0  ;;  %v1046_v3 = vadd.f32 %v1859_v15, %v1045_v1  ;;  %v919_v4 = vpop.f32.mrb[59].mxu0  ;;  %v1047_v5 = vpop.f32.mrb[59].mxu1 }
 0x17f   : > { %1086 = vst [vmem:[%s1863_s8 + $0xe8] sm:$0xff] %v918_v2  ;;  %1118 = vst [vmem:[%s1863_s8 + $0x1e8] sm:$0xff] %v1046_v3 }
 0x182   : > { %v922_v6 = vpop.f32.mrb[60].mxu0  ;;  %v1050_v7 = vpop.f32.mrb[60].mxu1 }
 0x183   : > { %v923_v8 = vadd.f32 %v1859_v15, %v922_v6  ;;  %v1051_v9 = vadd.f32 %v1859_v15, %v1050_v7  ;;  %v924_v10 = vpop.f32.mrb[61].mxu0  ;;  %v1052_v11 = vpop.f32.mrb[61].mxu1 }
 0x184   : > { %v925_v12 = vpop.f32.mrb[62].mxu0  ;;  %v1053_v13 = vpop.f32.mrb[62].mxu1 }
 0x185   : > { %1087 = vst [vmem:[%s1863_s8 + $0xf0] sm:$0xff] %v923_v8  ;;  %1119 = vst [vmem:[%s1863_s8 + $0x1f0] sm:$0xff] %v1051_v9  ;;  %v926_v14 = vadd.f32 %v1859_v15, %v925_v12  ;;  %v1054_v16 = vadd.f32 %v1859_v15, %v1053_v13  ;;  %v927_v17 = vpop.f32.mrb[63].mxu0  ;;  %v1055_v18 = vpop.f32.mrb[63].mxu1 }
 0x187   : > { %1088 = vst [vmem:[%s1863_s8 + $0xf8] sm:$0xff] %v926_v14  ;;  %1120 = vst [vmem:[%s1863_s8 + $0x1f8] sm:$0xff] %v1054_v16 }
 0x188   : > { %1574 = shalt.err (!%p1571_p3)
}
 0x189   : > { %s1575_s30 = scalar_lea.hbm %s1990_s23, 8192  ;;  %s1579_s6 = scalar_lea.hbm %s2051_s3, 65536 }
 0x18a   : > { %p1576_p5 = scmp.ne.s32.totalorder %s1990_s23, %s1575_s30  ;;  %p1580_p9 = scmp.lt.u32.totalorder %s1990_s23, %s2051_s3 }
 0x18b   : > { %p1581_p10 = scmp.lt.u32.totalorder %s1579_s6, %s1575_s30  ;;  %p1583_p12 = scmp.lt.u32.totalorder %s1575_s30, %s1990_s23 }
 0x18c   : > { %p1577_p6 = pnand %p1576_p5, %p1706_p4 }
 0x18d   : > { %p1582_p11 = por %p1581_p10, %p1580_p9 }
 0x18e   : > { %p1578_p7 = pneg %p1577_p6 }
 0x18f   : > { %p1584_p13 = por %p1583_p12, %p1582_p11 }
 0x191   : > { %p1585_p0 = pnand %p1584_p13, %p1578_p7 }
 0x193   : > { %1588 = shalt.err (!%p1585_p0)
}
 0x194   : > { %s1644_s10 = smov 128   ;;  %s1645_s8 = smov 8  }
 0x195   : > { %1396 = dma.vmem_to_hbm [thread:$0]  (%p1706_p4), %s1992_s18, 8192, %s1990_s23, %s2002_s15, %s1644_s10, %s1644_s10, %s1645_s8  }
 0x196 PF: > { %p1402_p1 = scmp.ge.s32.totalorder %s1639_s17, 2  ;;  %s1154_s11 = sand.u32 1, %s1619_s12  }
 0x197   : > { %s1155_s19 = scalar_lea.sflag [#allocation3], %s1154_s11 }
 0x198   : > { %p1399_p2 = pnand %p1402_p1, %p1713_p8 }
 0x19a   : > { %1614 = dma.done.wait (!%p1399_p2), %s1155_s19, 8192  }
 0x19b   : > { %1616 = vsyncadd (!%p1399_p2), %s1155_s19, 4294959104  ;;  %s16_s17 = sadd.s32 1, %s1639_s17   ;;  %s2054_s12 = smov %s1623_s13 }
 0x19c   : > { %p13_p3 = scmp.ge.s32.totalorder %s16_s17, 10   ;;  %s2055_s13 = smov %s1627_s14 }
 0x19d   : > { %s2056_s14 = smov %s1719_s25  ;;  %s2057_s15 = smov %s1635_s16 }
 0x19e   : > { %s2058_s16 = smov %s2060_s20  ;;  %15 = sbr.rel (!%p13_p3) target bundleno = 4 (0x4), region = 74 }
 0x1a5   :  { %1160 = vsyncpa [#allocation3], 1 }
 0x1a6   :  { %1162 = vsyncpa [#allocation3 + $0x1], 1 }

</bundles_post_ra>
